<compile_context>
chip_gen: v7x
topology: tpu7x:2x2x1
jax: 0.10.0
libtpu: 0.0.40
codegen_flags: <defaults>
</compile_context>

<pallas_src>
import jax
import jax.numpy as jnp
from jax.experimental import pallas as pl
from jax.experimental.pallas import tpu as pltpu


def _attention_kernel(x_ref, w1_ref, b1_ref, w2_ref, o_ref):
    # Per-tile shapes (R = bags_per_tile * num_instances, D = num_in, H = 128,
    #                  BT = bags_per_tile, NI = num_instances):
    #   x_ref:  (R, D)  bf16      w1_ref: (D, H) bf16
    #   b1_ref: (1, H)  f32       w2_ref: (1, H) f32   (fc[2] weight as a row)
    #   o_ref:  (BT, NI) f32      per-bag softmax weights, instances on lanes
    bt, ni = o_ref.shape
    rows = x_ref.shape[0]

    # fc[0] + Tanh: bf16 MXU matmul with f32 accumulation; bias add and tanh in f32.
    h = jnp.tanh(
        jnp.dot(x_ref[...], w1_ref[...], preferred_element_type=jnp.float32)
        + b1_ref[...]
    )  # (R, H) f32

    # fc[2] (bias elided: a per-bag constant shift cancels exactly in softmax).
    # VPU multiply + lane reduce; an (R,128)x(128,1) MXU matmul would waste 127/128
    # output lanes.  TODO(synk): measure the MXU variant now that the MXU has slack.
    s = jnp.sum(h * w2_ref[...], axis=-1, keepdims=True)  # (R, 1) f32

    # Regroup per-row scores into (BT, NI) with instances on the lane axis:
    # iota-generated diagonal mask (VPU filler) + free leading-axis reshape +
    # sublane-group reduce.  Exact: each (bag, instance) slot picks one score.
    r_idx = jax.lax.broadcasted_iota(jnp.int32, (rows, ni), 0)
    c_idx = jax.lax.broadcasted_iota(jnp.int32, (rows, ni), 1)
    inst_sel = (r_idx % ni == c_idx).astype(jnp.float32)          # (R, NI)
    s_bi = jnp.sum((s * inst_sel).reshape(bt, ni, ni), axis=1)    # (BT, NI)

    # Per-bag softmax over the instance (lane) axis; exact normalization.
    m = jnp.max(s_bi, axis=-1, keepdims=True)
    e = jnp.exp(s_bi - m)
    denom = jnp.sum(e, axis=-1, keepdims=True)
    o_ref[...] = (e / denom).astype(o_ref.dtype)


def _choose_tiling(n_bags, num_instances, rows_cap, min_tiles=2):
    """Pick (bags_per_tile, padded n_bags).

    bags_per_tile is rounded up to a multiple of 8 so the (rows, num_in) and
    (bags, num_instances) blocks satisfy the (8, 128) tiling rule; n_bags is
    padded so bags_per_tile always divides it.  min_tiles >= 2 keeps both v7x
    TensorCores busy whenever there is enough work to split.
    """
    bags_cap = max(8, rows_cap // num_instances)
    n_tiles = max(min_tiles, pl.cdiv(n_bags, bags_cap))
    bpt = pl.cdiv(pl.cdiv(n_bags, n_tiles), 8) * 8
    n_pad = pl.cdiv(n_bags, bpt) * bpt
    return bpt, n_pad


def attention_forward(x, w1, b1, w2, b2=None, *, num_instances,
                      max_rows_per_tile=4096):
    """x: (B*num_instances, num_in) -> (B, num_instances, 1)."""
    total, num_in = x.shape
    assert total % num_instances == 0
    n_bags = total // num_instances
    hidden = w1.shape[1]
    # NOTE: num_instances that is a multiple of 8 (module default: 32) keeps the
    # in-kernel (BT, NI, NI) regroup on aligned sublane boundaries.

    # bf16 MXU inputs; f32 accumulation and all post-matmul math stay f32.
    x_mxu = x.astype(jnp.bfloat16)
    w1_mxu = w1.astype(jnp.bfloat16)
    b1_row = b1.reshape(1, hidden).astype(jnp.float32)
    w2_row = w2.reshape(1, hidden).astype(jnp.float32)
    # b2 is intentionally not passed to the kernel: softmax is shift-invariant per bag.

    # Row cap keeps the double-buffered x tile plus f32 intermediates comfortably
    # under every generation's VMEM (v7x: 64 MiB physical / 32 MiB scoped).
    rows_cap = max(256, min(max_rows_per_tile, (2 << 20) // max(1, 2 * num_in)))
    bags_per_tile, n_bags_pad = _choose_tiling(n_bags, num_instances, rows_cap)
    rows_per_tile = bags_per_tile * num_instances
    n_tiles = n_bags_pad // bags_per_tile

    if n_bags_pad != n_bags:
        pad_rows = (n_bags_pad - n_bags) * num_instances
        x_mxu = jnp.pad(x_mxu, ((0, pad_rows), (0, 0)))  # zero rows -> finite softmax, sliced off

    attn = pl.pallas_call(
        _attention_kernel,
        out_shape=jax.ShapeDtypeStruct((n_bags_pad, num_instances), jnp.float32),
        grid_spec=pltpu.PrefetchScalarGridSpec(
            num_scalar_prefetch=0,
            grid=(n_tiles,),
            in_specs=[
                pl.BlockSpec((rows_per_tile, num_in), lambda t: (t, 0)),
                pl.BlockSpec((num_in, hidden), lambda t: (0, 0)),
                pl.BlockSpec((1, hidden), lambda t: (0, 0)),
                pl.BlockSpec((1, hidden), lambda t: (0, 0)),
            ],
            out_specs=pl.BlockSpec((bags_per_tile, num_instances), lambda t: (t, 0)),
        ),
        compiler_params=pltpu.CompilerParams(
            dimension_semantics=("parallel",),   # bag-tiles shard across TCs on v7x
            vmem_limit_bytes=32 * 1024 * 1024,
        ),
    )(x_mxu, w1_mxu, b1_row, w2_row)

    # Drop padded bags; trailing size-1 dim added by a free reshape outside the kernel.
    return attn[:n_bags].reshape(n_bags, num_instances, 1).astype(x.dtype)


def _reference_forward(x, w1, b1, w2, b2, *, num_instances):
    h = jnp.tanh(x @ w1 + b1)
    s = h @ w2 + b2
    s = s.reshape(-1, num_instances, 1)
    return jax.nn.softmax(s, axis=1)


if __name__ == "__main__":
    num_in = 32
    hidden = 128
    num_instances = 32  # module default

    key = jax.random.PRNGKey(0)
    kx, k1, k2, k3, k4 = jax.random.split(key, 5)

    # Deterministic parameter init (nn.Linear-style uniform bounds).
    bound1 = 1.0 / (num_in ** 0.5)
    w1 = jax.random.uniform(k1, (num_in, hidden), jnp.float32, -bound1, bound1)
    b1 = jax.random.uniform(k2, (hidden,), jnp.float32, -bound1, bound1)
    bound2 = 1.0 / (hidden ** 0.5)
    w2 = jax.random.uniform(k3, (hidden, 1), jnp.float32, -bound2, bound2)
    b2 = jax.random.uniform(k4, (1,), jnp.float32, -bound2, bound2)

    # 4 bags -> padded to one 8-bag tile (exercises padding + slicing);
    # 64 bags -> two 32-bag tiles (exercises the multi-step grid / megacore path).
    for n_bags in (4, 64):
        kx, sub = jax.random.split(kx)
        x = jax.random.normal(sub, (n_bags * num_instances, num_in), dtype=jnp.float32)

        out = attention_forward(x, w1, b1, w2, b2, num_instances=num_instances)
        out = jax.block_until_ready(out)
        ref = _reference_forward(x, w1, b1, w2, b2, num_instances=num_instances)

        assert out.shape == (n_bags, num_instances, 1)
        # Exact normalization inside the kernel: per-bag weights sum to 1.
        sums = jnp.sum(out, axis=1)
        assert jnp.allclose(sums, 1.0, atol=1e-5), float(jnp.max(jnp.abs(sums - 1.0)))
        # Tolerance accommodates the bf16 MXU inputs for fc[0] (accumulation is f32).
        err = float(jnp.max(jnp.abs(out - ref)))
        assert jnp.allclose(out, ref, atol=2e-3, rtol=2e-3), err

    print("KERNEL_OK")
</pallas_src>

<mosaic_0001>
module attributes {stable_mosaic.version = 11 : i64} {
  func.func @_attention_kernel(%arg0: i32, %arg1: memref<256x32xbf16, #tpu.memory_space<vmem>>, %arg2: memref<32x128xbf16, #tpu.memory_space<vmem>>, %arg3: memref<1x128xf32, #tpu.memory_space<vmem>>, %arg4: memref<1x128xf32, #tpu.memory_space<vmem>>, %arg5: memref<8x32xf32, #tpu.memory_space<vmem>>) attributes {dimension_semantics = [#tpu.dimension_semantics<parallel>], iteration_bounds = array<i64: 1>, scalar_prefetch = 0 : i64, scratch_operands = 0 : i64, tpu.core_type = #tpu.core_type<tc>, window_params = [{transform_indices = @transform_0, window_bounds = array<i64: 256, 32>}, {pipeline_mode = #tpu.pipeline_mode<synchronous>, transform_indices = @transform_1, window_bounds = array<i64: 32, 128>}, {pipeline_mode = #tpu.pipeline_mode<synchronous>, transform_indices = @transform_2, window_bounds = array<i64: 1, 128>}, {pipeline_mode = #tpu.pipeline_mode<synchronous>, transform_indices = @transform_3, window_bounds = array<i64: 1, 128>}, {transform_indices = @transform_4, window_bounds = array<i64: 8, 32>}]} {
    %c0 = arith.constant 0 : index
    %c0_0 = arith.constant 0 : index
    %0 = vector.load %arg1[%c0, %c0_0] : memref<256x32xbf16, #tpu.memory_space<vmem>>, vector<256x32xbf16>
    %c0_1 = arith.constant 0 : index
    %c0_2 = arith.constant 0 : index
    %1 = vector.load %arg2[%c0_1, %c0_2] : memref<32x128xbf16, #tpu.memory_space<vmem>>, vector<32x128xbf16>
    %cst = arith.constant dense<0.000000e+00> : vector<256x128xf32>
    %2 = tpu.matmul %0, %1, %cst {dimension_numbers = #tpu.dot_dimension_numbers<[1], [0], [0], [1], [0, 0, 1, 1], [], []>} : vector<256x32xbf16>, vector<32x128xbf16>, vector<256x128xf32> -> vector<256x128xf32>
    %c0_3 = arith.constant 0 : index
    %c0_4 = arith.constant 0 : index
    %3 = vector.load %arg3[%c0_3, %c0_4] : memref<1x128xf32, #tpu.memory_space<vmem>>, vector<1x128xf32>
    %4 = vector.broadcast %3 : vector<1x128xf32> to vector<256x128xf32>
    %5 = arith.addf %2, %4 : vector<256x128xf32>
    %6 = math.tanh %5 : vector<256x128xf32>
    %c0_5 = arith.constant 0 : index
    %c0_6 = arith.constant 0 : index
    %7 = vector.load %arg4[%c0_5, %c0_6] : memref<1x128xf32, #tpu.memory_space<vmem>>, vector<1x128xf32>
    %8 = vector.broadcast %7 : vector<1x128xf32> to vector<256x128xf32>
    %9 = arith.mulf %6, %8 : vector<256x128xf32>
    %cst_7 = arith.constant dense<0.000000e+00> : vector<256xf32>
    %10 = vector.multi_reduction <add>, %9, %cst_7 [1] : vector<256x128xf32> to vector<256xf32>
    %11 = vector.shape_cast %10 : vector<256xf32> to vector<256x1xf32>
    %12 = tpu.iota {dimensions = array<i32: 0>} : vector<256x32xi32>
    %13 = tpu.iota {dimensions = array<i32: 1>} : vector<256x32xi32>
    %c32_i32 = arith.constant 32 : i32
    %c0_i32 = arith.constant 0 : i32
    %14 = arith.cmpi eq, %c32_i32, %c0_i32 : i32
    %c1_i32 = arith.constant 1 : i32
    %15 = arith.select %14, %c1_i32, %c32_i32 : i32
    %16 = vector.broadcast %15 : i32 to vector<256x32xi32>
    %17 = arith.remsi %12, %16 : vector<256x32xi32>
    %c0_i32_8 = arith.constant 0 : i32
    %18 = vector.broadcast %c0_i32_8 : i32 to vector<256x32xi32>
    %19 = arith.cmpi ne, %17, %18 : vector<256x32xi32>
    %c0_i32_9 = arith.constant 0 : i32
    %20 = vector.broadcast %c0_i32_9 : i32 to vector<256x32xi32>
    %21 = arith.cmpi slt, %17, %20 : vector<256x32xi32>
    %c0_i32_10 = arith.constant 0 : i32
    %22 = arith.cmpi slt, %15, %c0_i32_10 : i32
    %23 = vector.broadcast %22 : i1 to vector<256x32xi1>
    %24 = vector.broadcast %23 : vector<256x32xi1> to vector<256x32xi1>
    %25 = arith.xori %21, %24 : vector<256x32xi1>
    %26 = arith.andi %25, %19 : vector<256x32xi1>
    %27 = vector.broadcast %15 : i32 to vector<256x32xi32>
    %28 = arith.addi %17, %27 : vector<256x32xi32>
    %29 = arith.select %26, %28, %17 : vector<256x32xi1>, vector<256x32xi32>
    %30 = arith.cmpi eq, %29, %13 : vector<256x32xi32>
    %31 = arith.extui %30 : vector<256x32xi1> to vector<256x32xi32>
    %32 = arith.sitofp %31 : vector<256x32xi32> to vector<256x32xf32>
    %33 = vector.broadcast %11 : vector<256x1xf32> to vector<256x32xf32>
    %34 = arith.mulf %33, %32 : vector<256x32xf32>
    %35 = vector.shape_cast %34 : vector<256x32xf32> to vector<8x32x32xf32>
    %cst_11 = arith.constant dense<0.000000e+00> : vector<8x32xf32>
    %36 = vector.multi_reduction <add>, %35, %cst_11 [1] : vector<8x32x32xf32> to vector<8x32xf32>
    %cst_12 = arith.constant dense<0xFF800000> : vector<8xf32>
    %37 = vector.multi_reduction <maximumf>, %36, %cst_12 [1] : vector<8x32xf32> to vector<8xf32>
    %38 = vector.shape_cast %37 : vector<8xf32> to vector<8x1xf32>
    %39 = vector.broadcast %38 : vector<8x1xf32> to vector<8x32xf32>
    %40 = arith.subf %36, %39 : vector<8x32xf32>
    %41 = math.exp %40 : vector<8x32xf32>
    %cst_13 = arith.constant dense<0.000000e+00> : vector<8xf32>
    %42 = vector.multi_reduction <add>, %41, %cst_13 [1] : vector<8x32xf32> to vector<8xf32>
    %43 = vector.shape_cast %42 : vector<8xf32> to vector<8x1xf32>
    %44 = vector.broadcast %43 : vector<8x1xf32> to vector<8x32xf32>
    %45 = arith.divf %41, %44 : vector<8x32xf32>
    %c0_14 = arith.constant 0 : index
    %c0_15 = arith.constant 0 : index
    %46 = vector.load %arg5[%c0_14, %c0_15] : memref<8x32xf32, #tpu.memory_space<vmem>>, vector<8x32xf32>
    tpu.vector_store %arg5[%c0_14, %c0_15], %45 {strides = array<i32>} : memref<8x32xf32, #tpu.memory_space<vmem>>, vector<8x32xf32>,
    return
  }
  func.func @transform_0(%arg0: i32) -> (i32, i32) {
    %c0_i32 = arith.constant 0 : i32
    %c0_i32_0 = arith.constant 0 : i32
    return %arg0, %c0_i32 : i32, i32
  }
  func.func @transform_1(%arg0: i32) -> (i32, i32) {
    %c0_i32 = arith.constant 0 : i32
    %c0_i32_0 = arith.constant 0 : i32
    %c0_i32_1 = arith.constant 0 : i32
    return %c0_i32, %c0_i32_0 : i32, i32
  }
  func.func @transform_2(%arg0: i32) -> (i32, i32) {
    %c0_i32 = arith.constant 0 : i32
    %c0_i32_0 = arith.constant 0 : i32
    %c0_i32_1 = arith.constant 0 : i32
    return %c0_i32, %c0_i32_0 : i32, i32
  }
  func.func @transform_3(%arg0: i32) -> (i32, i32) {
    %c0_i32 = arith.constant 0 : i32
    %c0_i32_0 = arith.constant 0 : i32
    %c0_i32_1 = arith.constant 0 : i32
    return %c0_i32, %c0_i32_0 : i32, i32
  }
  func.func @transform_4(%arg0: i32) -> (i32, i32) {
    %c0_i32 = arith.constant 0 : i32
    %c0_i32_0 = arith.constant 0 : i32
    return %arg0, %c0_i32 : i32, i32
  }
}

</mosaic_0001>

<bundles_post_ra>
// kernel: tpu_custom_call.1
= control target key start
LH: loop header
LB: loop body
LE: loop exit
PB: predicated region body
PF: predicated region fallthrough
CT: control target
= control target key end

     0   :  { %vm154_vm0 = vcmask 261120   ;;  %s2091_s0 = inlined_call_operand.vmem [shape: bf16[256,32], index: 0, kind: input, shape index: {}]   ;;  %s2092_s1 = inlined_call_operand.vmem [shape: bf16[32,128], index: 1, kind: input, shape index: {}]   ;;  %s2093_s2 = inlined_call_operand.vmem [shape: f32[1,128], index: 2, kind: input, shape index: {}]   ;;  %s2094_s3 = inlined_call_operand.vmem [shape: f32[1,128], index: 3, kind: input, shape index: {}]   ;;  %s2095_s4 = inlined_call_operand.hbm [shape: f32[8,32], index: 4, kind: output, shape index: {}]  }
   0x1   :  { %v1440_v0 = vld [vmem:[%s2092_s1] sm:$0xff]   ;;  %v1441_v1 = vld [vmem:[%s2092_s1 + $0x8] sm:$0xff]   ;;  %v1446_v6 = vld [vmem:[%s2091_s0 + $0x10] sm:$0xff]  }
   0x2   :  { %1398 = vmatprep.subr.bf16.mxu0 %v1440_v0  ;;  %1434 = vmatprep.subr.bf16.mxu1 %v1440_v0  ;;  %v1442_v2 = vld [vmem:[%s2091_s0] sm:$0xff]   ;;  %v1444_v4 = vld [vmem:[%s2091_s0 + $0x8] sm:$0xff]   ;;  %v1448_v7 = vld [vmem:[%s2091_s0 + $0x50] sm:$0xff]  }
   0x3   :  { %1399 = vmatpush3.bf16.msra.mxu0 %v1440_v0  ;;  %1436 = vmatpush3.bf16.msra.mxu1 %v1440_v0  ;;  %v1443_v3 = vld [vmem:[%s2091_s0 + $0x40] sm:$0xff]   ;;  %v1445_v5 = vld [vmem:[%s2091_s0 + $0x48] sm:$0xff]   ;;  %v1447_v8 = vld [vmem:[%s2091_s0 + $0x18] sm:$0xff]  }
   0x4   :  { %1400 = vmatprep.subr.bf16.mxu0 %v1441_v1  ;;  %1435 = vmatprep.subr.bf16.mxu1 %v1441_v1  ;;  %v1449_v9 = vld [vmem:[%s2091_s0 + $0x58] sm:$0xff]   ;;  %v1450_v10 = vld [vmem:[%s2091_s0 + $0x20] sm:$0xff]  }
   0x5   :  { %1402 = vmatprep.mubr.msk.bf16.mxu0 %vm154_vm0, %v1442_v2  ;;  %1418 = vmatprep.mubr.msk.bf16.mxu1 %vm154_vm0, %v1443_v3  ;;  %v1452_v11 = vld [vmem:[%s2091_s0 + $0x60] sm:$0xff]  }
   0x7   :  { %1401 = vmatpush3.bf16.msra.mxu0 %v1441_v1  ;;  %1437 = vmatpush3.bf16.msra.mxu1 %v1441_v1 }
   0xa   :  { %1403 = vmatmul.mubr.msk.bf16.vlgmr.msra.gmra.mrb[0].mxu0 %vm154_vm0, %v1444_v4  ;;  %1419 = vmatmul.mubr.msk.bf16.vlgmr.msra.gmra.mrb[0].mxu1 %vm154_vm0, %v1445_v5 }
   0xb   :  { %1406 = vmatprep.mubr.msk.bf16.mxu0 %vm154_vm0, %v1446_v6  ;;  %1422 = vmatprep.mubr.msk.bf16.mxu1 %vm154_vm0, %v1448_v7 }
  0x12   :  { %1407 = vmatmul.mubr.msk.bf16.gmra.mrb[4].mxu0 %vm154_vm0, %v1447_v8  ;;  %1423 = vmatmul.mubr.msk.bf16.gmra.mrb[4].mxu1 %vm154_vm0, %v1449_v9 }
  0x13   :  { %9 = vsyncpa [#allocation3], 0  ;;  %1410 = vmatprep.mubr.msk.bf16.mxu0 %vm154_vm0, %v1450_v10  ;;  %1426 = vmatprep.mubr.msk.bf16.mxu1 %vm154_vm0, %v1452_v11  ;;  %v1451_v12 = vld [vmem:[%s2091_s0 + $0x28] sm:$0xff]   ;;  %v1454_v14 = vld [vmem:[%s2091_s0 + $0x30] sm:$0xff]  }
  0x14   :  { %v1453_v13 = vld [vmem:[%s2091_s0 + $0x68] sm:$0xff]   ;;  %v1456_v15 = vld [vmem:[%s2091_s0 + $0x70] sm:$0xff]   ;;  %v1455_v16 = vld [vmem:[%s2091_s0 + $0x38] sm:$0xff]  }
  0x15   :  { %v1457_v17 = vld [vmem:[%s2091_s0 + $0x78] sm:$0xff]   ;;  %v1678_v18 = vld [vmem:[%s2093_s2] ss:$0 sm:$0xff] }
  0x16   :  { %v1691_v42 = vld [vmem:[%s2094_s3] ss:$0 sm:$0xff]  ;;  %s1579_s3 = smov [#allocation2]  }
  0x17   :  { %s1304_s25 = sshll.u32 %s1579_s3, 4  ;;  %s1305_s25 = int_to_ptr.vmem [resolvable:$true] %s1304_s25 }
  0x18   :  { %s1554_s26 = scalar_lea.vmem %s1305_s25, 128  ;;  %p1559_p1 = scmp.lt.s32.totalorder %s1305_s25, %s1305_s25 }
  0x19   :  { %p1555_p0 = scmp.ne.s32.totalorder %s1305_s25, %s1554_s26  ;;  %p1560_p2 = scmp.lt.s32.totalorder %s1554_s26, %s1554_s26 }
  0x1a   :  { %1411 = vmatmul.mubr.msk.bf16.gmra.mrb[8].mxu0 %vm154_vm0, %v1451_v12  ;;  %1427 = vmatmul.mubr.msk.bf16.gmra.mrb[8].mxu1 %vm154_vm0, %v1453_v13 }
  0x1b   :  { %1414 = vmatprep.mubr.msk.bf16.mxu0 %vm154_vm0, %v1454_v14  ;;  %1430 = vmatprep.mubr.msk.bf16.mxu1 %vm154_vm0, %v1456_v15  ;;  %p1561_p3 = por %p1560_p2, %p1559_p1 }
  0x1d   :  { %p1562_p4 = pnand %p1561_p3, %p1555_p0 }
  0x22   :  { %1415 = vmatmul.mubr.msk.bf16.gmra.mrb[12].mxu0 %vm154_vm0, %v1455_v16  ;;  %1431 = vmatmul.mubr.msk.bf16.gmra.mrb[12].mxu1 %vm154_vm0, %v1457_v17 }
  0xdd   :  { %v1404_v19 = vpop.f32.mrb[0].mxu0  ;;  %v1420_v20 = vpop.f32.mrb[0].mxu1 }
  0xde   :  { %v246_v21 = vadd.f32 %v1404_v19, %v1678_v18  ;;  %v310_v22 = vadd.f32 %v1420_v20, %v1678_v18  ;;  %v237_v23 = vpop.f32.mrb[1].mxu0  ;;  %v301_v24 = vpop.f32.mrb[1].mxu1 }
  0xdf   :  { %v238_v25 = vadd.f32 %v1678_v18, %v237_v23  ;;  %v302_v26 = vadd.f32 %v1678_v18, %v301_v24  ;;  %v1405_v27 = vpop.f32.mrb[2].mxu0  ;;  %v1421_v28 = vpop.f32.mrb[2].mxu1 }
  0xe0   :  { %1458 = vtanh.f32 %v246_v21  ;;  %v240_v29 = vpop.f32.mrb[3].mxu0  ;;  %v304_v30 = vpop.f32.mrb[3].mxu1  ;;  %v313_v31 = vadd.f32 %v1421_v28, %v1678_v18  ;;  %v249_v32 = vadd.f32 %v1405_v27, %v1678_v18 }
  0xe1   :  { %1460 = vtanh.f32 %v310_v22  ;;  %v241_v35 = vadd.f32 %v1678_v18, %v240_v29  ;;  %v305_v46 = vadd.f32 %v1678_v18, %v304_v30 }
  0xe2   :  { %1462 = vtanh.f32 %v238_v25 }
  0xe3   :  { %1464 = vtanh.f32 %v302_v26 }
  0xe4   :  { %1466 = vtanh.f32 %v313_v31 }
  0xe5   :  { %v1408_v33 = vpop.f32.mrb[4].mxu0  ;;  %v1424_v34 = vpop.f32.mrb[4].mxu1  ;;  %1468 = vtanh.f32 %v249_v32 }
  0xe6   :  { %v262_v36 = vadd.f32 %v1408_v33, %v1678_v18  ;;  %v253_v37 = vpop.f32.mrb[5].mxu0  ;;  %v317_v38 = vpop.f32.mrb[5].mxu1  ;;  %v326_v44 = vadd.f32 %v1424_v34, %v1678_v18 }
  0xe7   :  { %v1409_v39 = vpop.f32.mrb[6].mxu0  ;;  %v1425_v40 = vpop.f32.mrb[6].mxu1  ;;  %v318_v54 = vadd.f32 %v1678_v18, %v317_v38  ;;  %v254_v57 = vadd.f32 %v1678_v18, %v253_v37 }
  0xe8   :  { %v256_v41 = vpop.f32.mrb[7].mxu0  ;;  %v320_v43 = vpop.f32.mrb[7].mxu1  ;;  %1470 = vtanh.f32 %v262_v36  ;;  %v265_v2 = vadd.f32 %v1409_v39, %v1678_v18  ;;  %v329_v10 = vadd.f32 %v1425_v40, %v1678_v18 }
  0xe9   :  { %1472 = vtanh.f32 %v241_v35  ;;  %v257_v4 = vadd.f32 %v1678_v18, %v256_v41  ;;  %v321_v15 = vadd.f32 %v1678_v18, %v320_v43 }
  0xea   :  { %v1459_v45 = vpop.eup %1458  ;;  %1474 = vtanh.f32 %v326_v44 }
  0xeb   :  { %v1461_v47 = vpop.eup %1460  ;;  %v405_v48 = vmul.f32 %v1459_v45, %v1691_v42  ;;  %1476 = vtanh.f32 %v305_v46 }
  0xec   :  { %v1463_v49 = vpop.eup %1462  ;;  %v421_v50 = vmul.f32 %v1461_v47, %v1691_v42  ;;  %1478 = vtanh.f32 %v318_v54 }
  0xed   :  { %v1465_v51 = vpop.eup %1464  ;;  %439 = vadd.xlane.f32.xlu0 %v405_v48  ;;  %v1412_v52 = vpop.f32.mrb[8].mxu0  ;;  %v403_v58 = vmul.f32 %v1463_v49, %v1691_v42  ;;  %1480 = vtanh.f32 %v254_v57 }
  0xee   :  { %v1428_v53 = vpop.f32.mrb[8].mxu1  ;;  %471 = vadd.xlane.f32.xlu1 %v421_v50  ;;  %v269_v55 = vpop.f32.mrb[9].mxu0  ;;  %v419_v62 = vmul.f32 %v1465_v51, %v1691_v42  ;;  %1482 = vtanh.f32 %v265_v2  ;;  %v278_v21 = vadd.f32 %v1412_v52, %v1678_v18 }
  0xef   :  { %v333_v56 = vpop.f32.mrb[9].mxu1  ;;  %v1700_v59 = vpop.f32.mrb[10].mxu0  ;;  %1484 = vtanh.f32 %v257_v4  ;;  %v342_v24 = vadd.f32 %v1428_v53, %v1678_v18  ;;  %v270_v29 = vadd.f32 %v1678_v18, %v269_v55 }
  0xf0   :  { %v1702_v60 = vpop.f32.mrb[10].mxu1  ;;  %v1467_v61 = vpop.eup %1466  ;;  %1486 = vtanh.f32 %v329_v10  ;;  %v334_v35 = vadd.f32 %v1678_v18, %v333_v56  ;;  %v281_v44 = vadd.f32 %v1700_v59, %v1678_v18 }
  0xf1   :  { %v272_v63 = vpop.f32.mrb[11].mxu0  ;;  %v336_v0 = vpop.f32.mrb[11].mxu1  ;;  %435 = vadd.xlane.f32.xlu0 %v403_v58  ;;  %v422_v5 = vmul.f32 %v1467_v61, %v1691_v42  ;;  %1488 = vtanh.f32 %v321_v15 }
  0xf2   :  { %v1469_v1 = vpop.eup %1468  ;;  %467 = vadd.xlane.f32.xlu1 %v419_v62  ;;  %1490 = vtanh.f32 %v278_v21  ;;  %v273_v30 = vadd.f32 %v1678_v18, %v272_v63  ;;  %v337_v36 = vadd.f32 %v1678_v18, %v336_v0 }
  0xf3   :  { %v1471_v3 = vpop.eup %1470  ;;  %v406_v7 = vmul.f32 %v1469_v1, %v1691_v42  ;;  %1492 = vtanh.f32 %v342_v24 }
  0xf4   :  { %v1473_v6 = vpop.eup %1472  ;;  %v409_v11 = vmul.f32 %v1471_v3, %v1691_v42  ;;  %1494 = vtanh.f32 %v270_v29  ;;  %v345_v3 = vadd.f32 %v1702_v60, %v1678_v18 }
  0xf5   :  { %473 = vadd.xlane.f32.xlu0 %v422_v5  ;;  %v1416_v8 = vpop.f32.mrb[12].mxu0  ;;  %v1432_v9 = vpop.f32.mrb[12].mxu1  ;;  %v404_v16 = vmul.f32 %v1473_v6, %v1691_v42  ;;  %1496 = vtanh.f32 %v273_v30 }
  0xf6   :  { %441 = vadd.xlane.f32.xlu1 %v406_v7  ;;  %v285_v12 = vpop.f32.mrb[13].mxu0  ;;  %v1711_v13 = vpop.f32.mrb[13].mxu1  ;;  %v294_v41 = vadd.f32 %v1416_v8, %v1678_v18  ;;  %1498 = vtanh.f32 %v334_v35  ;;  %v358_v48 = vadd.f32 %v1432_v9, %v1678_v18 }
  0xf7   :  { %v1475_v14 = vpop.eup %1474  ;;  %v1715_v17 = vpop.f32.mrb[14].mxu0  ;;  %1500 = vtanh.f32 %v337_v36  ;;  %v286_v50 = vadd.f32 %v1678_v18, %v285_v12  ;;  %v350_v54 = vadd.f32 %v1678_v18, %v1711_v13 }
  0xf8   :  { %v1717_v19 = vpop.f32.mrb[14].mxu1  ;;  %v1477_v20 = vpop.eup %1476  ;;  %v425_v25 = vmul.f32 %v1475_v14, %v1691_v42  ;;  %1502 = vtanh.f32 %v294_v41  ;;  %v297_v61 = vadd.f32 %v1715_v17, %v1678_v18 }
  0xf9   :  { %v288_v22 = vpop.f32.mrb[15].mxu0  ;;  %v1720_v23 = vpop.f32.mrb[15].mxu1  ;;  %437 = vadd.xlane.f32.xlu0 %v404_v16  ;;  %v420_v26 = vmul.f32 %v1477_v20, %v1691_v42  ;;  %1504 = vtanh.f32 %v281_v44  ;;  %v361_v6 = vadd.f32 %v1717_v19, %v1678_v18 }
  0xfa   :  { %447 = vadd.xlane.f32.xlu1 %v409_v11  ;;  %v1479_v27 = vpop.eup %1478  ;;  %1506 = vtanh.f32 %v358_v48  ;;  %v289_v55 = vadd.f32 %v1678_v18, %v288_v22  ;;  %v353_v63 = vadd.f32 %v1678_v18, %v1720_v23  ;;  %v499_v22 = vlaneseq }
  0xfb   :  { %v1481_v28 = vpop.eup %1480  ;;  %v423_v31 = vmul.f32 %v1479_v27, %v1691_v42  ;;  %1508 = vtanh.f32 %v286_v50 }
  0xfc   :  { %v1483_v32 = vpop.eup %1482  ;;  %v407_v33 = vmul.f32 %v1481_v28, %v1691_v42  ;;  %1510 = vtanh.f32 %v350_v54  ;;  %v1767_v23 = vshrl.u32 %v499_v22, 7 }
  0xfd   :  { %469 = vadd.xlane.f32.xlu0 %v420_v26  ;;  %v1485_v34 = vpop.eup %1484  ;;  %v410_v37 = vmul.f32 %v1483_v32, %v1691_v42  ;;  %1512 = vtanh.f32 %v289_v55 }
  0xfe   :  { %479 = vadd.xlane.f32.xlu1 %v425_v25  ;;  %v1487_v38 = vpop.eup %1486  ;;  %v408_v39 = vmul.f32 %v1485_v34, %v1691_v42  ;;  %1514 = vtanh.f32 %v297_v61  ;;  %v518_v25 = vadd.s32 144, %v1767_v23  ;;  %v502_v27 = vadd.s32 16, %v1767_v23 }
  0xff   :  { %v1489_v40 = vpop.eup %1488  ;;  %v426_v46 = vmul.f32 %v1487_v38, %v1691_v42  ;;  %1516 = vtanh.f32 %v353_v63  ;;  %v516_v28 = vadd.s32 128, %v1767_v23  ;;  %v503_v29 = vadd.s32 24, %v1767_v23 }
 0x100   :  { %v1491_v43 = vpop.eup %1490  ;;  %v424_v47 = vmul.f32 %v1489_v40, %v1691_v42  ;;  %1518 = vtanh.f32 %v345_v3  ;;  %v552_v32 = vand.u32 31, %v502_v27  ;;  %v519_v34 = vadd.s32 152, %v1767_v23 }
 0x101   :  { %475 = vadd.xlane.f32.xlu0 %v423_v31  ;;  %v1493_v45 = vpop.eup %1492  ;;  %v413_v49 = vmul.f32 %v1491_v43, %v1691_v42  ;;  %1520 = vtanh.f32 %v361_v6  ;;  %v664_v31 = vand.u32 31, %v518_v25  ;;  %v650_v35 = vand.u32 31, %v516_v28 }
 0x102   :  { %443 = vadd.xlane.f32.xlu1 %v407_v33  ;;  %v429_v51 = vmul.f32 %v1493_v45, %v1691_v42  ;;  %v1495_v52 = vpop.eup %1494  ;;  %v538_v36 = vand.u32 31, %v1767_v23  ;;  %v501_v38 = vadd.s32 8, %v1767_v23  ;;  %v517_v40 = vadd.s32 136, %v1767_v23 }
 0x103   :  { %v1497_v53 = vpop.eup %1496  ;;  %v411_v56 = vmul.f32 %v1495_v52, %v1691_v42  ;;  %v522_v43 = vadd.s32 176, %v1767_v23  ;;  %v671_v45 = vand.u32 31, %v519_v34  ;;  %v504_v50 = vadd.s32 32, %v1767_v23 }
 0x104   :  { %v1499_v57 = vpop.eup %1498  ;;  %v412_v58 = vmul.f32 %v1497_v53, %v1691_v42  ;;  %v545_v48 = vand.u32 31, %v501_v38  ;;  %v1578_v52 = vmov 0.0   ;;  %v523_v6 = vadd.s32 184, %v1767_v23 }
 0x105   :  { %449 = vadd.xlane.f32.xlu0 %v410_v37  ;;  %v1501_v59 = vpop.eup %1500  ;;  %v427_v0 = vmul.f32 %v1499_v57, %v1691_v42  ;;  %v506_v37 = vadd.s32 48, %v1767_v23  ;;  %v692_v55 = vand.u32 31, %v522_v43  ;;  %v524_v25 = vadd.s32 192, %v1767_v23 }
 0x106   :  { %445 = vadd.xlane.f32.xlu1 %v408_v39  ;;  %v1503_v62 = vpop.eup %1502  ;;  %v428_v2 = vmul.f32 %v1501_v59, %v1691_v42  ;;  %v559_v39 = vand.u32 31, %v503_v29  ;;  %v505_v59 = vadd.s32 40, %v1767_v23  ;;  %v530_v43 = vadd.s32 240, %v1767_v23 }
 0x107   :  { %v1505_v1 = vpop.eup %1504  ;;  %v417_v4 = vmul.f32 %v1503_v62, %v1691_v42 }
 0x108   :  { %v1507_v5 = vpop.eup %1506  ;;  %v414_v7 = vmul.f32 %v1505_v1, %v1691_v42 }
 0x109   :  { %481 = vadd.xlane.f32.xlu0 %v426_v46  ;;  %v1509_v8 = vpop.eup %1508  ;;  %v433_v9 = vmul.f32 %v1507_v5, %v1691_v42  ;;  %v521_v5 = vadd.s32 168, %v1767_v23 }
 0x10a   :  { %477 = vadd.xlane.f32.xlu1 %v424_v47  ;;  %v415_v60 = vmul.f32 %v1509_v8, %v1691_v42  ;;  %v1511_v10 = vpop.eup %1510  ;;  %v580_v47 = vand.u32 31, %v506_v37  ;;  %v512_v37 = vadd.s32 96, %v1767_v23 }
 0x10b   :  { %v1513_v11 = vpop.eup %1512  ;;  %v431_v12 = vmul.f32 %v1511_v10, %v1691_v42  ;;  %v510_v10 = vadd.s32 80, %v1767_v23 }
 0x10c   :  { %v1515_v13 = vpop.eup %1514  ;;  %v416_v18 = vmul.f32 %v1513_v11, %v1691_v42 }
 0x10d   :  { %455 = vadd.xlane.f32.xlu0 %v413_v49  ;;  %v1517_v14 = vpop.eup %1516  ;;  %v418_v15 = vmul.f32 %v1515_v13, %v1691_v42  ;;  %v657_v49 = vand.u32 31, %v517_v40  ;;  %v509_v13 = vadd.s32 72, %v1767_v23 }
 0x10e   :  { %487 = vadd.xlane.f32.xlu1 %v429_v51  ;;  %v1519_v16 = vpop.eup %1518  ;;  %v432_v17 = vmul.f32 %v1517_v14, %v1691_v42  ;;  %v520_v51 = vadd.s32 160, %v1767_v23 }
 0x10f   :  { %v1521_v19 = vpop.eup %1520  ;;  %v430_v20 = vmul.f32 %v1519_v16, %v1691_v42  ;;  %v601_v34 = vand.u32 31, %v509_v13 }
 0x110   :  { %v434_v21 = vmul.f32 %v1521_v19, %v1691_v42  ;;  %v1779_v42 = vand.u32 127, %v499_v22  ;;  %v678_v1 = vand.u32 31, %v520_v51  ;;  %v525_v22 = vadd.s32 200, %v1767_v23 }
 0x111   :  { %451 = vadd.xlane.f32.xlu0 %v411_v56 }
 0x112   :  { %453 = vadd.xlane.f32.xlu1 %v412_v58  ;;  %vm936_vm1 = vcmp.eq.s32.totalorder %v664_v31, %v1779_v42  ;;  %vm920_vm2 = vcmp.eq.s32.totalorder %v552_v32, %v1779_v42  ;;  %vm934_vm3 = vcmp.eq.s32.totalorder %v650_v35, %v1779_v42  ;;  %vm1797_vm4 = vcmp.eq.s32.totalorder %v538_v36, %v1779_v42 }
 0x113   :  { %vm921_vm5 = vcmp.eq.s32.totalorder %v559_v39, %v1779_v42  ;;  %v1805_v53 = vsel %vm936_vm1, 1.0, %v1578_v52  ;;  %v1810_v56 = vsel %vm920_vm2, 1.0, %v1578_v52  ;;  %v1813_v57 = vsel %vm934_vm3, 1.0, %v1578_v52 }
 0x114   :  { %vm937_vm6 = vcmp.eq.s32.totalorder %v671_v45, %v1779_v42  ;;  %v1822_v61 = vsel %vm1797_vm4, 1.0, %v1578_v52  ;;  %v1825_v62 = vsel %vm921_vm5, 1.0, %v1578_v52  ;;  %vm1828_vm7 = vcmp.eq.s32.totalorder %v580_v47, %v1779_v42 }
 0x115   :  { %483 = vadd.xlane.f32.xlu0 %v427_v0  ;;  %vm919_vm8 = vcmp.eq.s32.totalorder %v545_v48, %v1779_v42  ;;  %vm935_vm9 = vcmp.eq.s32.totalorder %v657_v49, %v1779_v42  ;;  %v566_v0 = vand.u32 31, %v504_v50  ;;  %v1836_v3 = vsel %vm937_vm6, 1.0, %v1578_v52 }
 0x116   :  { %485 = vadd.xlane.f32.xlu1 %v428_v2  ;;  %v507_v2 = vadd.s32 56, %v1767_v23  ;;  %vm940_vm10 = vcmp.eq.s32.totalorder %v692_v55, %v1779_v42  ;;  %v1851_v11 = vsel %vm1828_vm7, 1.0, %v1578_v52  ;;  %vm1865_vm12 = vcmp.eq.s32.totalorder %v678_v1, %v1779_v42 }
 0x117   :  { %v1857_v14 = vsel %vm940_vm10, 1.0, %v1578_v52  ;;  %vm1860_vm11 = vcmp.eq.s32.totalorder %v566_v0, %v1779_v42  ;;  %v608_v31 = vand.u32 31, %v510_v10  ;;  %v511_v32 = vadd.s32 88, %v1767_v23 }
 0x118   :  { %v514_v36 = vadd.s32 112, %v1767_v23  ;;  %v1352_v38 = vsel %vm1860_vm11, 1.0, %v1578_v52  ;;  %v1887_v39 = vsel %vm1865_vm12, 1.0, %v1578_v52  ;;  %v713_v46 = vand.u32 31, %v525_v22 }
 0x119   :  { %457 = vadd.xlane.f32.xlu0 %v414_v7  ;;  %v1349_v7 = vsel %vm919_vm8, 1.0, %v1578_v52  ;;  %v706_v47 = vand.u32 31, %v524_v25  ;;  %vm928_vm3 = vcmp.eq.s32.totalorder %v608_v31, %v1779_v42  ;;  %v615_v51 = vand.u32 31, %v511_v32 }
 0x11a   :  { %463 = vadd.xlane.f32.xlu1 %v417_v4  ;;  %vm927_vm4 = vcmp.eq.s32.totalorder %v601_v34, %v1779_v42  ;;  %v636_v55 = vand.u32 31, %v514_v36  ;;  %vm943_vm6 = vcmp.eq.s32.totalorder %v713_v46, %v1779_v42  ;;  %v1959_v32 = vadd.s32 224, %v1767_v23 }
 0x11b   :  { %vm942_vm7 = vcmp.eq.s32.totalorder %v706_v47, %v1779_v42  ;;  %v1357_v13 = vsel %vm927_vm4, 1.0, %v1578_v52  ;;  %vm929_vm8 = vcmp.eq.s32.totalorder %v615_v51, %v1779_v42  ;;  %v1973_v36 = vadd.s32 120, %v1767_v23 }
 0x11c   :  { %v1939_v16 = vsel %vm942_vm7, 1.0, %v1578_v52  ;;  %v1359_v22 = vsel %vm929_vm8, 1.0, %v1578_v52  ;;  %vm1160_vm4 = vcmask 1042434   ;;  %vm1166_vm7 = vcmask 1045509  }
 0x11d   :  { %459 = vadd.xlane.f32.xlu0 %v415_v60  ;;  %v526_v60 = vadd.s32 208, %v1767_v23  ;;  %vm1168_vm8 = vcmask 1046534  }
 0x11e   :  { %495 = vadd.xlane.f32.xlu1 %v433_v9  ;;  %v573_v9 = vand.u32 31, %v505_v59  ;;  %v622_v59 = vand.u32 31, %v512_v37 }
 0x11f   :  { %v720_v29 = vand.u32 31, %v526_v60 }
 0x120   :  { %vm1874_vm13 = vcmp.eq.s32.totalorder %v573_v9, %v1779_v42  ;;  %v1358_v9 = vsel %vm928_vm3, 1.0, %v1578_v52  ;;  %vm930_vm10 = vcmp.eq.s32.totalorder %v622_v59, %v1779_v42  ;;  %vm1158_vm3 = vcmask 1041409  }
 0x121   :  { %491 = vadd.xlane.f32.xlu0 %v431_v12  ;;  %v1365_v12 = vsel %vm935_vm9, 1.0, %v1578_v52  ;;  %v1353_v48 = vsel %vm1874_vm13, 1.0, %v1578_v52  ;;  %vm1903_vm2 = vcmp.eq.s32.totalorder %v720_v29, %v1779_v42  ;;  %vm932_vm9 = vcmp.eq.s32.totalorder %v636_v55, %v1779_v42 }
 0x122   :  { %461 = vadd.xlane.f32.xlu1 %v416_v18  ;;  %v508_v18 = vadd.s32 64, %v1767_v23  ;;  %v1926_v10 = vsel %vm1903_vm2, 1.0, %v1578_v52  ;;  %v1953_v29 = vsel %vm932_vm9, 1.0, %v1578_v52  ;;  %v1956_v31 = vsel %vm930_vm10, 1.0, %v1578_v52 }
 0x123   :  { %vm1170_vm9 = vcmask 1047559  }
 0x124   :  { %v594_v35 = vand.u32 31, %v508_v18 }
 0x125   :  { %465 = vadd.xlane.f32.xlu0 %v418_v15  ;;  %v1936_v15 = vsel %vm943_vm6, 1.0, %v1578_v52  ;;  %vm1164_vm6 = vcmask 1044484  }
 0x126   :  { %493 = vadd.xlane.f32.xlu1 %v432_v17  ;;  %v587_v17 = vand.u32 31, %v507_v2  ;;  %vm926_vm5 = vcmp.eq.s32.totalorder %v594_v35, %v1779_v42  ;;  %v748_v2 = vand.u32 31, %v530_v43  ;;  %v1970_v35 = vadd.s32 232, %v1767_v23 }
 0x127   :  { %v1356_v18 = vsel %vm926_vm5, 1.0, %v1578_v52  ;;  %vm1162_vm5 = vcmask 1043459  }
 0x128   :  { %vm1890_vm14 = vcmp.eq.s32.totalorder %v587_v17, %v1779_v42  ;;  %vm948_vm11 = vcmp.eq.s32.totalorder %v748_v2, %v1779_v42  ;;  %v1943_v17 = vadd.s32 104, %v1767_v23 }
 0x129   :  { %489 = vadd.xlane.f32.xlu0 %v430_v20  ;;  %v685_v20 = vand.u32 31, %v521_v5  ;;  %v1355_v63 = vsel %vm1890_vm14, 1.0, %v1578_v52 }
 0x12a   :  { %497 = vadd.xlane.f32.xlu1 %v434_v21  ;;  %v699_v21 = vand.u32 31, %v523_v6  ;;  %v629_v34 = vand.u32 31, %v1943_v17 }
 0x12b   :  { %vm939_vm15 = vcmp.eq.s32.totalorder %v685_v20, %v1779_v42 }
 0x12c   :  { %vm941_vm1 = vcmp.eq.s32.totalorder %v699_v21, %v1779_v42  ;;  %v1369_v0 = vsel %vm939_vm15, 1.0, %v1578_v52  ;;  %vm931_vm12 = vcmp.eq.s32.totalorder %v629_v34, %v1779_v42 }
 0x12d   :  { %v1915_v1 = vsel %vm941_vm1, 1.0, %v1578_v52 }
 0x17a   :  { %v1769_v24 = vpop.xlane.xlu0 %439 }
 0x17b   :  { %v1772_v26 = vpop.xlane.xlu1 %471  ;;  %v1016_v25 = vmul.f32 %v1810_v56, %v1769_v24  ;;  %v1966_v24 = vsel %vm948_vm11, 1.0, %v1578_v52 }
 0x17c   :  { %v1032_v43 = vmul.f32 %v1805_v53, %v1772_v26  ;;  %v531_v26 = vadd.s32 248, %v1767_v23 }
 0x17d   :  { %v1049_v46 = vsel %vm154_vm0, %v1016_v25, 0.0 }
 0x17e   :  { %v1777_v30 = vpop.xlane.xlu0 %435 }
 0x17f   :  { %v1781_v33 = vpop.xlane.xlu1 %467 }
 0x182   :  { %v1788_v41 = vpop.xlane.xlu0 %473 }
 0x183   :  { %v1793_v44 = vpop.xlane.xlu1 %441 }
 0x184   :  { %v1017_v51 = vmul.f32 %v1825_v62, %v1793_v44  ;;  %v1101_v44 = vsel %vm154_vm0, %v1032_v43, 0.0  ;;  %v1033_v62 = vmul.f32 %v1836_v3, %v1788_v41  ;;  %v741_v41 = vand.u32 31, %v1970_v35 }
 0x185   :  { %v643_v3 = vand.u32 31, %v1973_v36 }
 0x186   :  { %v1807_v54 = vpop.xlane.xlu0 %437  ;;  %vm947_vm14 = vcmp.eq.s32.totalorder %v741_v41, %v1779_v42 }
 0x187   :  { %v1816_v58 = vpop.xlane.xlu1 %447  ;;  %v1015_v5 = vmul.f32 %v1349_v7, %v1807_v54  ;;  %v1014_v54 = vmul.f32 %v1822_v61, %v1777_v30  ;;  %vm2020_vm15 = vcmp.eq.s32.totalorder %v643_v3, %v1779_v42 }
 0x188   :  { %v1020_v37 = vmul.f32 %v1851_v11, %v1816_v58 }
 0x189   :  { %v1047_v20 = vsel %vm154_vm0, %v1015_v5, 0.0 }
 0x18a   :  { %v1839_v4 = vpop.xlane.xlu0 %469  ;;  %v1062_v53 = vsel %vm154_vm0, %v1020_v37, 0.0 }
 0x18b   :  { %v1844_v8 = vpop.xlane.xlu1 %479  ;;  %v1031_v30 = vmul.f32 %v1365_v12, %v1839_v4  ;;  %v1030_v4 = vmul.f32 %v1813_v57, %v1781_v33  ;;  %v1046_v12 = vsel %vm154_vm0, %v1014_v54, 0.0  ;;  %v1051_v54 = vsel %vm154_vm0, %v1017_v51, 0.0 }
 0x18c   :  { %v1048_v56 = vadd.f32 %v1047_v20, %v1046_v12 }
 0x18d   :  { %v1099_v33 = vsel %vm154_vm0, %v1031_v30, 0.0  ;;  %v1098_v50 = vsel %vm154_vm0, %v1030_v4, 0.0 }
 0x18e   :  { %v1869_v19 = vpop.xlane.xlu0 %475  ;;  %v1050_v55 = vadd.f32 %v1049_v46, %v1048_v56  ;;  %v1100_v59 = vadd.f32 %v1099_v33, %v1098_v50  ;;  %v1103_v56 = vsel %vm154_vm0, %v1033_v62, 0.0 }
 0x18f   :  { %v444_v27 = vpop.xlane.xlu1 %443  ;;  %v1034_v58 = vmul.f32 %v1887_v39, %v1869_v19 }
 0x190   :  { %v1018_v61 = vmul.f32 %v1352_v38, %v444_v27  ;;  %v1052_v17 = vadd.f32 %v1051_v54, %v1050_v55  ;;  %v1102_v20 = vadd.f32 %v1101_v44, %v1100_v59 }
 0x192   :  { %v1895_v45 = vpop.xlane.xlu0 %449  ;;  %v1059_v57 = vsel %vm154_vm0, %v1018_v61, 0.0  ;;  %v734_v61 = vand.u32 31, %v1959_v32  ;;  %v1104_v35 = vadd.f32 %v1103_v56, %v1102_v20 }
 0x193   :  { %v446_v49 = vpop.xlane.xlu1 %445  ;;  %v1021_v2 = vmul.f32 %v1355_v63, %v1895_v45  ;;  %v1111_v45 = vsel %vm154_vm0, %v1034_v58, 0.0 }
 0x194   :  { %v1019_v7 = vmul.f32 %v1353_v48, %v446_v49  ;;  %vm2013_vm13 = vcmp.eq.s32.totalorder %v734_v61, %v1779_v42  ;;  %v1105_v51 = vrot.slane %v1104_v35, 4 }
 0x195   :  { %v1064_v25 = vsel %vm154_vm0, %v1021_v2, 0.0  ;;  %v1376_v55 = vsel %vm2013_vm13, 1.0, %v1578_v52  ;;  %v1363_v2 = vsel %vm2020_vm15, 1.0, %v1578_v52 }
 0x196   :  { %v1918_v6 = vpop.xlane.xlu0 %481  ;;  %v1060_v27 = vsel %vm154_vm0, %v1019_v7, 0.0  ;;  %v1036_v7 = vmul.f32 %v1857_v14, %v1844_v8 }
 0x197   :  { %v478_v60 = vpop.xlane.xlu1 %477  ;;  %v1061_v47 = vadd.f32 %v1060_v27, %v1059_v57  ;;  %v755_v27 = vand.u32 31, %v531_v26  ;;  %v1037_v32 = vmul.f32 %v1915_v1, %v1918_v6  ;;  %v1053_v57 = vrot.slane %v1052_v17, 4 }
 0x198   :  { %v1035_v38 = vmul.f32 %v1369_v0, %v478_v60  ;;  %v1114_v37 = vsel %vm154_vm0, %v1036_v7, 0.0 }
 0x199   :  { %v1063_v19 = vadd.f32 %v1062_v53, %v1061_v47  ;;  %vm949_vm1 = vcmp.eq.s32.totalorder %v755_v27, %v1779_v42  ;;  %v1054_v50 = vadd.f32 %v1053_v57, %v1052_v17 }
 0x19a   :  { %v456_v21 = vpop.xlane.xlu0 %455  ;;  %v1112_v5 = vsel %vm154_vm0, %v1035_v38, 0.0 }
 0x19b   :  { %v1950_v28 = vpop.xlane.xlu1 %487  ;;  %v1024_v39 = vmul.f32 %v1358_v9, %v456_v21  ;;  %v1113_v30 = vadd.f32 %v1112_v5, %v1111_v45  ;;  %v527_v9 = vadd.s32 216, %v1767_v23  ;;  %v1065_v21 = vadd.f32 %v1064_v25, %v1063_v19 }
 0x19c   :  { %v1379_v5 = vsel %vm949_vm1, 1.0, %v1578_v52  ;;  %v1055_v62 = vrot.slane %v1054_v50, 2  ;;  %v1106_v19 = vadd.f32 %v1105_v51, %v1104_v35 }
 0x19d   :  { %v1075_v8 = vsel %vm154_vm0, %v1024_v39, 0.0  ;;  %v1115_v38 = vadd.f32 %v1114_v37, %v1113_v30  ;;  %v727_v43 = vand.u32 31, %v527_v9  ;;  %v1066_v46 = vrot.slane %v1065_v21, 4 }
 0x19e   :  { %v452_v40 = vpop.xlane.xlu0 %451  ;;  %v1056_v3 = vadd.f32 %v1055_v62, %v1054_v50 }
 0x19f   :  { %v454_v48 = vpop.xlane.xlu1 %453  ;;  %v1022_v49 = vmul.f32 %v1356_v18, %v452_v40  ;;  %vm945_vm2 = vcmp.eq.s32.totalorder %v727_v43, %v1779_v42 }
 0x1a0   :  { %v1023_v11 = vmul.f32 %v1357_v13, %v454_v48  ;;  %v1116_v48 = vsel %vm154_vm0, %v1037_v32, 0.0  ;;  %v1375_v42 = vsel %vm945_vm2, 1.0, %v1578_v52  ;;  %v1057_v51 = vrot.slane %v1056_v3, 1 }
 0x1a1   :  { %v1072_v0 = vsel %vm154_vm0, %v1022_v49, 0.0  ;;  %v1117_v58 = vadd.f32 %v1116_v48, %v1115_v38 }
 0x1a2   :  { %v1073_v60 = vsel %vm154_vm0, %v1023_v11, 0.0  ;;  %v484_v18 = vpop.xlane.xlu0 %483 }
 0x1a3   :  { %v486_v13 = vpop.xlane.xlu1 %485  ;;  %v1074_v63 = vadd.f32 %v1073_v60, %v1072_v0  ;;  %v1038_v47 = vmul.f32 %v1939_v16, %v484_v18  ;;  %v1361_v16 = vsel %vm931_vm12, 1.0, %v1578_v52  ;;  %v1377_v0 = vsel %vm947_vm14, 1.0, %v1578_v52 }
 0x1a4   :  { %v1039_v34 = vmul.f32 %v1936_v15, %v486_v13  ;;  %v1067_v15 = vadd.f32 %v1066_v46, %v1065_v21  ;;  %v1118_v39 = vrot.slane %v1117_v58, 4  ;;  %v1040_v13 = vmul.f32 %v1926_v10, %v1950_v28 }
 0x1a5   :  { %v1076_v33 = vadd.f32 %v1075_v8, %v1074_v63  ;;  %v1124_v26 = vsel %vm154_vm0, %v1038_v47, 0.0  ;;  %v1107_v21 = vrot.slane %v1106_v19, 2 }
 0x1a6   :  { %v458_v4 = vpop.xlane.xlu0 %457  ;;  %v1068_v17 = vrot.slane %v1067_v15, 2  ;;  %v1119_v9 = vadd.f32 %v1118_v39, %v1117_v58  ;;  %v1127_v8 = vsel %vm154_vm0, %v1040_v13, 0.0 }
 0x1a7   :  { %v464_v14 = vpop.xlane.xlu1 %463  ;;  %v1025_v12 = vmul.f32 %v1359_v22, %v458_v4 }
 0x1a8   :  { %v1028_v60 = vmul.f32 %v1953_v29, %v464_v14  ;;  %v1069_v56 = vadd.f32 %v1068_v17, %v1067_v15 }
 0x1a9   :  { %v1077_v36 = vsel %vm154_vm0, %v1025_v12, 0.0 }
 0x1aa   :  { %v1078_v23 = vadd.f32 %v1077_v36, %v1076_v33  ;;  %v460_v40 = vpop.xlane.xlu0 %459  ;;  %v1088_v25 = vsel %vm154_vm0, %v1028_v60, 0.0 }
 0x1ab   :  { %v496_v1 = vpop.xlane.xlu1 %495  ;;  %v1026_v11 = vmul.f32 %v1956_v31, %v460_v40  ;;  %v1125_v31 = vsel %vm154_vm0, %v1039_v34, 0.0  ;;  %v1108_v34 = vadd.f32 %v1107_v21, %v1106_v19 }
 0x1ac   :  { %v1079_v49 = vrot.slane %v1078_v23, 4  ;;  %v1126_v20 = vadd.f32 %v1125_v31, %v1124_v26  ;;  %v1044_v41 = vmul.f32 %v1966_v24, %v496_v1  ;;  %v1070_v1 = vrot.slane %v1069_v56, 1 }
 0x1ad   :  { %v1085_v54 = vsel %vm154_vm0, %v1026_v11, 0.0  ;;  %v1109_v26 = vrot.slane %v1108_v34, 1 }
 0x1ae   :  { %v492_v59 = vpop.xlane.xlu0 %491  ;;  %v1080_v18 = vadd.f32 %v1079_v49, %v1078_v23  ;;  %v1140_v35 = vsel %vm154_vm0, %v1044_v41, 0.0  ;;  %v1128_v36 = vadd.f32 %v1127_v8, %v1126_v20  ;;  %v1120_v23 = vrot.slane %v1119_v9, 2 }
 0x1af   :  { %v462_v53 = vpop.xlane.xlu1 %461  ;;  %v1042_v45 = vmul.f32 %v1376_v55, %v492_v59  ;;  %v1071_v59 = vadd.f32 %v1070_v1, %v1069_v56  ;;  %v1110_v13 = vadd.f32 %v1109_v26, %v1108_v34 }
 0x1b0   :  { %v1027_v44 = vmul.f32 %v1361_v16, %v462_v53  ;;  %v1081_v4 = vrot.slane %v1080_v18, 2  ;;  %v1121_v58 = vadd.f32 %v1120_v23, %v1119_v9 }
 0x1b1   :  { %v1137_v14 = vsel %vm154_vm0, %v1042_v45, 0.0 }
 0x1b2   :  { %v1086_v7 = vsel %vm154_vm0, %v1027_v44, 0.0  ;;  %v466_v63 = vpop.xlane.xlu0 %465  ;;  %v1082_v24 = vadd.f32 %v1081_v4, %v1080_v18  ;;  %v1122_v31 = vrot.slane %v1121_v58, 1 }
 0x1b3   :  { %v1087_v30 = vadd.f32 %v1086_v7, %v1085_v54  ;;  %v494_v29 = vpop.xlane.xlu1 %493  ;;  %v1029_v61 = vmul.f32 %v1363_v2, %v466_v63 }
 0x1b4   :  { %v1043_v52 = vmul.f32 %v1377_v0, %v494_v29  ;;  %v1083_v49 = vrot.slane %v1082_v24, 1  ;;  %v1123_v7 = vadd.f32 %v1122_v31, %v1121_v58 }
 0x1b5   :  { %v1089_v10 = vadd.f32 %v1088_v25, %v1087_v30  ;;  %v1090_v28 = vsel %vm154_vm0, %v1029_v61, 0.0 }
 0x1b6   :  { %v1138_v12 = vsel %vm154_vm0, %v1043_v52, 0.0  ;;  %v490_v27 = vpop.xlane.xlu0 %489  ;;  %v1084_v53 = vadd.f32 %v1083_v49, %v1082_v24 }
 0x1b7   :  { %v1139_v37 = vadd.f32 %v1138_v12, %v1137_v14  ;;  %v1091_v32 = vadd.f32 %v1090_v28, %v1089_v10  ;;  %v498_v33 = vpop.xlane.xlu1 %497  ;;  %v1041_v57 = vmul.f32 %v1375_v42, %v490_v27 }
 0x1b8   :  { %v1045_v38 = vmul.f32 %v1379_v5, %v498_v33  ;;  %v1058_v5 = vadd.f32 %v1057_v51, %v1056_v3 }
 0x1b9   :  { %v1092_v40 = vrot.slane %v1091_v32, 4  ;;  %v1141_v22 = vadd.f32 %v1140_v35, %v1139_v37  ;;  %v1129_v43 = vsel %vm154_vm0, %v1041_v57, 0.0 }
 0x1ba   :  { %v1142_v46 = vsel %vm154_vm0, %v1045_v38, 0.0  ;;  %v1130_v47 = vadd.f32 %v1129_v43, %v1128_v36  ;;  %v1159_v62 = vsel %vm1158_vm3, %v1071_v59, %v1058_v5 }
 0x1bb   :  { %v1093_v6 = vadd.f32 %v1092_v40, %v1091_v32  ;;  %v1143_v48 = vadd.f32 %v1142_v46, %v1141_v22  ;;  %v1161_v54 = vsel %vm1160_vm4, %v1084_v53, %v1159_v62 }
 0x1bc   :  { %v1131_v50 = vrot.slane %v1130_v47, 4 }
 0x1bd   :  { %v1094_v16 = vrot.slane %v1093_v6, 2  ;;  %v1144_v11 = vrot.slane %v1143_v48, 4 }
 0x1be   :  { %v1132_v55 = vadd.f32 %v1131_v50, %v1130_v47 }
 0x1bf   :  { %v1095_v0 = vadd.f32 %v1094_v16, %v1093_v6  ;;  %v1145_v15 = vadd.f32 %v1144_v11, %v1143_v48 }
 0x1c0   :  { %v1133_v2 = vrot.slane %v1132_v55, 2 }
 0x1c1   :  { %v1096_v60 = vrot.slane %v1095_v0, 1  ;;  %v1146_v18 = vrot.slane %v1145_v15, 2 }
 0x1c2   :  { %v1134_v44 = vadd.f32 %v1133_v2, %v1132_v55 }
 0x1c3   :  { %v1097_v19 = vadd.f32 %v1096_v60, %v1095_v0  ;;  %v1147_v39 = vadd.f32 %v1146_v18, %v1145_v15 }
 0x1c4   :  { %v1135_v42 = vrot.slane %v1134_v44, 1 }
 0x1c5   :  { %v1148_v45 = vrot.slane %v1147_v39, 1  ;;  %v1163_v63 = vsel %vm1162_vm5, %v1097_v19, %v1161_v54 }
 0x1c6   :  { %v1136_v17 = vadd.f32 %v1135_v42, %v1134_v44  ;;  %v1165_v20 = vsel %vm1164_vm6, %v1110_v13, %v1163_v63 }
 0x1c7   :  { %v1149_v30 = vadd.f32 %v1148_v45, %v1147_v39  ;;  %v1167_v29 = vsel %vm1166_vm7, %v1123_v7, %v1165_v20 }
 0x1c8   :  { %v1169_v61 = vsel %vm1168_vm8, %v1136_v17, %v1167_v29 }
 0x1c9   :  { %v1171_v25 = vsel %vm1170_vm9, %v1149_v30, %v1169_v61 }
 0x1ca   :  { %v1173_v4 = vsel %vm154_vm0, %v1171_v25, -inf }
 0x1cb   :  { %1174 = vmax.xlane.f32.xlu0 %v1173_v4 }
 0x258   :  { %v1175_v41 = vpop.xlane.xlu0 %1174 }
 0x259   :  { %v1177_v52 = vrot.slane %v1175_v41, 1  ;;  %v1178_v3 = vrot.slane %v1175_v41, 2  ;;  %v1179_v9 = vrot.slane %v1175_v41, 3  ;;  %v1180_v10 = vrot.slane %v1175_v41, 4 }
 0x25a   :  { %v1181_v28 = vrot.slane %v1175_v41, 5  ;;  %v1182_v21 = vrot.slane %v1175_v41, 6  ;;  %v1183_v8 = vrot.slane %v1175_v41, 7  ;;  %v1192_v14 = vsub.f32 %v1058_v5, %v1175_v41 }
 0x25b   :  { %v1193_v12 = vsub.f32 %v1071_v59, %v1177_v52  ;;  %v1194_v27 = vsub.f32 %v1084_v53, %v1178_v3  ;;  %v1195_v56 = vsub.f32 %v1097_v19, %v1179_v9  ;;  %v1196_v37 = vsub.f32 %v1110_v13, %v1180_v10 }
 0x25c   :  { %v1197_v32 = vsub.f32 %v1123_v7, %v1181_v28  ;;  %v1198_v33 = vsub.f32 %v1136_v17, %v1182_v21  ;;  %v1200_v57 = vmul.f32 1.442695, %v1192_v14  ;;  %v1199_v24 = vsub.f32 %v1149_v30, %v1183_v8 }
 0x25d   :  { %v1202_v35 = vmul.f32 1.442695, %v1193_v12  ;;  %v1204_v38 = vmul.f32 1.442695, %v1194_v27  ;;  %v1206_v36 = vmul.f32 1.442695, %v1195_v56 }
 0x25e   :  { %1522 = vpow2.f32 %v1200_v57  ;;  %v1208_v23 = vmul.f32 1.442695, %v1196_v37  ;;  %v1210_v40 = vmul.f32 1.442695, %v1197_v32  ;;  %v1212_v22 = vmul.f32 1.442695, %v1198_v33 }
 0x25f   :  { %1524 = vpow2.f32 %v1202_v35  ;;  %v1214_v43 = vmul.f32 1.442695, %v1199_v24 }
 0x260   :  { %1526 = vpow2.f32 %v1204_v38 }
 0x261   :  { %1528 = vpow2.f32 %v1206_v36 }
 0x262   :  { %1530 = vpow2.f32 %v1208_v23 }
 0x263   :  { %1532 = vpow2.f32 %v1210_v40 }
 0x264   :  { %1534 = vpow2.f32 %v1212_v22 }
 0x265   :  { %1536 = vpow2.f32 %v1214_v43 }
 0x268   :  { %v1523_v46 = vpop.eup %1522 }
 0x269   :  { %v1525_v47 = vpop.eup %1524 }
 0x26a   :  { %v1527_v1 = vpop.eup %1526  ;;  %v1224_v6 = vrot.slane %v1525_v47, 7 }
 0x26b   :  { %v1529_v48 = vpop.eup %1528  ;;  %v1226_v34 = vrot.slane %v1527_v1, 6 }
 0x26c   :  { %v1531_v49 = vpop.eup %1530  ;;  %v1225_v50 = vsel %vm1158_vm3, %v1224_v6, %v1523_v46  ;;  %v1228_v51 = vrot.slane %v1529_v48, 5 }
 0x26d   :  { %v1533_v58 = vpop.eup %1532  ;;  %v1227_v16 = vsel %vm1160_vm4, %v1226_v34, %v1225_v50  ;;  %v1230_v11 = vrot.slane %v1531_v49, 4 }
 0x26e   :  { %v1535_v55 = vpop.eup %1534  ;;  %v1229_v59 = vsel %vm1162_vm5, %v1228_v51, %v1227_v16  ;;  %v1232_v0 = vrot.slane %v1533_v58, 3 }
 0x26f   :  { %v1537_v15 = vpop.eup %1536  ;;  %v1231_v26 = vsel %vm1164_vm6, %v1230_v11, %v1229_v59  ;;  %v1234_v53 = vrot.slane %v1535_v55, 2 }
 0x270   :  { %v1233_v2 = vsel %vm1166_vm7, %v1232_v0, %v1231_v26  ;;  %v1236_v5 = vrot.slane %v1537_v15, 1 }
 0x271   :  { %v1235_v31 = vsel %vm1168_vm8, %v1234_v53, %v1233_v2 }
 0x272   :  { %v1237_v60 = vsel %vm1170_vm9, %v1236_v5, %v1235_v31 }
 0x273   :  { %v1239_v18 = vsel %vm154_vm0, %v1237_v60, 0.0 }
 0x274   :  { %1240 = vadd.xlane.f32.xlu1 %v1239_v18 }
 0x301   :  { %v1241_v44 = vpop.xlane.xlu1 %1240 }
 0x302   :  { %v1243_v62 = vrot.slane %v1241_v44, 1  ;;  %v1244_v19 = vrot.slane %v1241_v44, 2  ;;  %v1245_v39 = vrot.slane %v1241_v44, 3  ;;  %v1246_v42 = vrot.slane %v1241_v44, 4 }
 0x303   :  { %1538 = vrcp.f32 %v1241_v44  ;;  %v1247_v13 = vrot.slane %v1241_v44, 5  ;;  %v1248_v54 = vrot.slane %v1241_v44, 6  ;;  %v1249_v7 = vrot.slane %v1241_v44, 7 }
 0x304   :  { %1540 = vrcp.f32 %v1243_v62 }
 0x305   :  { %1542 = vrcp.f32 %v1244_v19 }
 0x306   :  { %1544 = vrcp.f32 %v1245_v39 }
 0x307   :  { %1546 = vrcp.f32 %v1246_v42 }
 0x308   :  { %1548 = vrcp.f32 %v1247_v13 }
 0x309   :  { %1550 = vrcp.f32 %v1248_v54 }
 0x30a   :  { %1552 = vrcp.f32 %v1249_v7 }
 0x30d   :  { %v1539_v45 = vpop.eup %1538 }
 0x30e   :  { %v1541_v63 = vpop.eup %1540  ;;  %v1259_v25 = vmul.f32 %v1539_v45, %v1523_v46 }
 0x30f   :  { %v1543_v17 = vpop.eup %1542  ;;  %v1261_v20 = vmul.f32 %v1541_v63, %v1525_v47 }
 0x310   :  { %v1545_v30 = vpop.eup %1544  ;;  %v1263_v29 = vmul.f32 %v1543_v17, %v1527_v1 }
 0x311   :  { %v1547_v61 = vpop.eup %1546  ;;  %v1265_v4 = vmul.f32 %v1545_v30, %v1529_v48  ;;  %v1282_v41 = vrot.slane %v1261_v20, 7 }
 0x312   :  { %v1549_v52 = vpop.eup %1548  ;;  %v1267_v3 = vmul.f32 %v1547_v61, %v1531_v49  ;;  %v1284_v9 = vrot.slane %v1263_v29, 6 }
 0x313   :  { %v1551_v10 = vpop.eup %1550  ;;  %v1269_v28 = vmul.f32 %v1549_v52, %v1533_v58  ;;  %v1283_v21 = vsel %vm1158_vm3, %v1282_v41, %v1259_v25  ;;  %v1286_v8 = vrot.slane %v1265_v4, 5 }
 0x314   :  { %v1553_v14 = vpop.eup %1552  ;;  %v1271_v12 = vmul.f32 %v1551_v10, %v1535_v55  ;;  %v1285_v27 = vsel %vm1160_vm4, %v1284_v9, %v1283_v21  ;;  %v1288_v56 = vrot.slane %v1267_v3, 4 }
 0x315   :  { %v1273_v37 = vmul.f32 %v1553_v14, %v1537_v15  ;;  %v1287_v32 = vsel %vm1162_vm5, %v1286_v8, %v1285_v27  ;;  %v1290_v33 = vrot.slane %v1269_v28, 3 }
 0x316   :  { %v1289_v57 = vsel %vm1164_vm6, %v1288_v56, %v1287_v32  ;;  %v1292_v24 = vrot.slane %v1271_v12, 2 }
 0x317   :  { %v1291_v35 = vsel %vm1166_vm7, %v1290_v33, %v1289_v57  ;;  %v1294_v38 = vrot.slane %v1273_v37, 1 }
 0x318   :  { %v1293_v36 = vsel %vm1168_vm8, %v1292_v24, %v1291_v35 }
 0x319   :  { %v1295_v23 = vsel %vm1170_vm9, %v1294_v38, %v1293_v36 }
 0x31a   :  { %1297 = vst.msk [vmem:[#allocation2] sm:$0xff] %vm154_vm0, %v1295_v23 }
 0x31b   :  { %1565 = shalt.err (!%p1562_p4)
}
 0x31c   :  { %s1566_s29 = scalar_lea.hbm %s2095_s4, 128 }
 0x31d   :  { %p1567_p5 = scmp.ne.s32.totalorder %s2095_s4, %s1566_s29  ;;  %p1570_p6 = scmp.lt.u32.totalorder %s1566_s29, %s2095_s4 }
 0x31f   :  { %p1572_p7 = pnand %p1570_p6, %p1567_p5 }
 0x321   :  { %1575 = shalt.err (!%p1572_p7)
}
 0x322   :  { %1307 = dma.vmem_to_hbm [thread:$0]  %s1305_s25, 128, %s2095_s4, [#allocation3]  }
 0x323   :  { %1576 = dma.done.wait [#allocation3], 128  }
 0x324   :  { %1577 = vsyncadd [#allocation3], 4294967168 }
 0x325   :  { %1311 = vsyncpa [#allocation3], 1 }

</bundles_post_ra>
